<compile_context>
chip_gen: v5e
topology: v5e:2x2
jax: 0.10.0
libtpu: 0.0.40
codegen_flags: <defaults>
</compile_context>

<pallas_src>
import functools

import jax
import jax.numpy as jnp
from jax.experimental import pallas as pl
from jax.experimental.pallas import tpu as pltpu


# --------------------------------------------------------------------------------------
# Kernels.  Grid = (M/tm, nf/tn, nx/tk); the reduction axis (k = nx) is last.
# --------------------------------------------------------------------------------------

def _conv1d_kernel_single_k(x_ref, w_ref, b_ref, o_ref):
    """Whole contraction in one k step: dot + bias + cast, single store, no scratch."""
    acc = jnp.dot(x_ref[...], w_ref[...], preferred_element_type=jnp.float32)
    o_ref[...] = (acc + b_ref[...]).astype(o_ref.dtype)


def _conv1d_kernel_acc_in_out(x_ref, w_ref, b_ref, o_ref):
    """Multi-step reduction, float32 output: accumulate directly into the resident output
    block (bias folded into the k==0 init) -- no scratch and no finalize copy."""
    @pl.when(pl.program_id(2) == 0)
    def _():
        o_ref[...] = jnp.broadcast_to(b_ref[...], o_ref.shape)

    o_ref[...] += jnp.dot(x_ref[...], w_ref[...], preferred_element_type=jnp.float32)


def _conv1d_kernel_acc_scratch(x_ref, w_ref, b_ref, o_ref, acc_ref):
    """Multi-step reduction, non-f32 output: f32 VMEM accumulator, bias folded into the
    init, epilogue is just a cast."""
    @pl.when(pl.program_id(2) == 0)
    def _():
        acc_ref[...] = jnp.broadcast_to(b_ref[...], acc_ref.shape)

    acc_ref[...] += jnp.dot(x_ref[...], w_ref[...], preferred_element_type=jnp.float32)

    @pl.when(pl.program_id(2) == pl.num_programs(2) - 1)
    def _():
        o_ref[...] = acc_ref[...].astype(o_ref.dtype)


# --------------------------------------------------------------------------------------
# Per-generation configuration and tile selection helpers.
# --------------------------------------------------------------------------------------

def _round_up(x, m):
    return ((x + m - 1) // m) * m


@functools.lru_cache(maxsize=1)
def _gen_config():
    """Per-generation tile tables and VMEM budgets."""
    kind = ""
    try:
        kind = jax.devices()[0].device_kind.lower()
    except Exception:
        pass
    if "v7" in kind:
        gen = "v7x"
    elif "v6" in kind:
        gen = "v6e"
    elif "v5" in kind:
        gen = "v5e"
    else:
        gen = "unknown"

    try:
        phys_vmem = int(pltpu.get_tpu_info().vmem_capacity_bytes)
    except Exception:
        phys_vmem = {"v5e": 128 << 20, "v6e": 128 << 20, "v7x": 64 << 20}.get(gen, 64 << 20)

    if gen == "v6e":
        # ~650 flop/B ridge: go for 1024/2048-class tiles; 128 MiB physical VMEM.
        row_cands = (1024, 512, 256, 128)
        lane_cands = (2048, 1024, 512, 256, 128)
        k16_cands = (2048, 1024, 512, 256, 128)
        k32_cands = (1024, 512, 256, 128)
    elif gen == "v7x":
        # ~310 flop/B ridge but only 64 MiB physical VMEM: 1024-class tiles.
        row_cands = (1024, 512, 256, 128)
        lane_cands = (1024, 512, 256, 128)
        k16_cands = (1024, 512, 256, 128)
        k32_cands = (512, 256, 128)
    elif gen == "v5e":
        # ~240 flop/B ridge: 512-class tiles already sit at the roofline.
        row_cands = (512, 256, 128)
        lane_cands = (512, 256, 128)
        k16_cands = (1024, 512, 256, 128)
        k32_cands = (512, 256, 128)
    else:
        # Unknown chip: conservative (v7x-sized) tiles.
        row_cands = (512, 256, 128)
        lane_cands = (1024, 512, 256, 128)
        k16_cands = (1024, 512, 256, 128)
        k32_cands = (512, 256, 128)

    reserve = (24 << 20) if phys_vmem >= (96 << 20) else (20 << 20)
    return {
        "gen": gen,
        "row_cands": row_cands,
        "lane_cands": lane_cands,
        "k16_cands": k16_cands,
        "k32_cands": k32_cands,
        "tile_budget": max(16 << 20, phys_vmem - reserve),
        "vmem_cap": max(32 << 20, phys_vmem - (8 << 20)),
    }


def _pick_div_tile(dim, candidates):
    for c in candidates:
        if c <= dim and dim % c == 0:
            return c
    return None


def _pick_lane_or_k_tile(dim, candidates):
    """Return (tile, padded_dim).  Prefer a divisor candidate (largest / 256-multiples
    first); small dims use a full-extent block; large non-divisible dims (e.g. a vocab
    projection nf) are zero-padded to a 512 multiple so a lane-dense tile is available."""
    t = _pick_div_tile(dim, candidates)
    if t is not None:
        return t, dim
    if dim <= 512:
        return dim, dim
    dim_pad = _round_up(dim, 512)
    t = _pick_div_tile(dim_pad, candidates)
    return (t if t is not None else 512), dim_pad


def _pick_row_tile(m, sublane, candidates):
    """Return (tile, padded_rows).  Pads only to the sublane multiple; ragged large M
    falls back to a <=120-row pad (multiple of 128) instead of padding to tm."""
    m_pad = _round_up(m, sublane)
    if m_pad <= candidates[0]:
        return m_pad, m_pad
    t = _pick_div_tile(m_pad, candidates)
    if t is not None:
        return t, m_pad
    m_pad = _round_up(m_pad, candidates[-1])
    return _pick_div_tile(m_pad, candidates), m_pad


def _footprint_bytes(tm, tn, tk, in_itemsize, out_itemsize, use_scratch, w_bufs):
    fp = 2 * tm * tk * in_itemsize          # x blocks (double-buffered)
    fp += w_bufs * tk * tn * in_itemsize    # weight blocks
    fp += 2 * tn * 4                        # bias blocks (f32)
    fp += 2 * tm * tn * out_itemsize        # output blocks
    if use_scratch:
        fp += tm * tn * 4                   # f32 accumulator scratch
    return fp


# --------------------------------------------------------------------------------------
# Wrapper.
# --------------------------------------------------------------------------------------

@functools.partial(
    jax.jit,
    static_argnames=("tm", "tn", "tk", "compute_dtype", "out_dtype", "weight_buffers"),
)
def conv1d_forward(
    x,
    weight,
    bias,
    *,
    tm=None,
    tn=None,
    tk=None,
    compute_dtype=None,
    out_dtype=None,
    weight_buffers=None,
):
    """y = x @ weight + bias, with x: (..., nx), weight: (nx, nf), bias: (nf,)."""
    orig_shape = x.shape
    nx, nf = weight.shape
    if orig_shape[-1] != nx:
        raise ValueError(f"x last dim {orig_shape[-1]} does not match weight rows {nx}")

    cfg = _gen_config()
    cdt = jnp.dtype(compute_dtype) if compute_dtype is not None else jnp.dtype(x.dtype)
    odt = jnp.dtype(out_dtype) if out_dtype is not None else jnp.dtype(x.dtype)
    itemsize = cdt.itemsize
    sublane = {4: 8, 2: 16, 1: 32}.get(itemsize, 8)

    # NOTE: for decode, store `weight` in compute_dtype at the framework level so the cast
    # below is a no-op (otherwise it is an extra HBM pass over the whole weight per call).
    x2d = x.reshape(-1, nx)
    if x2d.dtype != cdt:
        x2d = x2d.astype(cdt)
    w = weight if weight.dtype == cdt else weight.astype(cdt)
    b2 = bias.reshape(1, nf).astype(jnp.float32)   # bias accumulated in f32
    M = x2d.shape[0]

    # ------------------------------ tile selection --------------------------------------
    row_cands = cfg["row_cands"]
    lane_cands = cfg["lane_cands"]
    k_cands = cfg["k16_cands"] if itemsize <= 2 else cfg["k32_cands"]
    auto_tm, auto_tn, auto_tk = tm is None, tn is None, tk is None

    if auto_tm:
        tm, m_pad = _pick_row_tile(M, sublane, row_cands)
    else:
        if tm % sublane != 0:
            raise ValueError(f"tm={tm} must be a multiple of {sublane} for {cdt} compute")
        m_pad = _round_up(M, tm)

    if auto_tn:
        tn, nf_pad = _pick_lane_or_k_tile(nf, lane_cands)
    else:
        if nf % tn != 0 or (tn % 128 != 0 and tn != nf):
            raise ValueError(f"tn={tn} must divide nf={nf} and be a multiple of 128 (or == nf)")
        nf_pad = nf

    if auto_tk:
        tk, nx_pad = _pick_lane_or_k_tile(nx, k_cands)
    else:
        if nx % tk != 0 or (tk % 128 != 0 and tk != nx):
            raise ValueError(f"tk={tk} must divide nx={nx} and be a multiple of 128 (or == nx)")
        nx_pad = nx

    # v7x decode: keep nf/tn >= 2 so the "parallel" j axis can shard over both TensorCores
    # even when there is only a single row block.
    if (cfg["gen"] == "v7x" and auto_tn and m_pad // tm == 1
            and nf_pad // tn == 1 and tn >= 256 and tn % 256 == 0):
        tn //= 2

    w_bufs = 2
    if weight_buffers is not None and int(weight_buffers) > 2:
        w_bufs = int(weight_buffers)

    # Shrink auto-chosen tiles until the pipeline footprint fits the generation's budget.
    budget = cfg["tile_budget"]
    while True:
        use_scratch = (nx_pad // tk > 1) and odt != jnp.float32
        fp = _footprint_bytes(tm, tn, tk, itemsize, odt.itemsize, use_scratch, w_bufs)
        if fp <= budget:
            break
        if auto_tk and tk > 256 and tk % 256 == 0:
            tk //= 2
        elif auto_tn and tn >= tm and tn > 256 and tn % 256 == 0:
            tn //= 2
        elif auto_tm and tm > sublane and tm % (2 * sublane) == 0:
            tm //= 2
        elif auto_tn and tn > 256 and tn % 256 == 0:
            tn //= 2
        else:
            break

    # ------------------------------ padding (only if needed) ----------------------------
    if m_pad != M or nx_pad != nx:
        x2d = jnp.pad(x2d, ((0, m_pad - M), (0, nx_pad - nx)))
    if nx_pad != nx or nf_pad != nf:
        w = jnp.pad(w, ((0, nx_pad - nx), (0, nf_pad - nf)))
    if nf_pad != nf:
        b2 = jnp.pad(b2, ((0, 0), (0, nf_pad - nf)))

    grid = (m_pad // tm, nf_pad // tn, nx_pad // tk)

    if grid[2] == 1:
        kernel = _conv1d_kernel_single_k
        scratch_shapes = ()
        use_scratch = False
    elif odt == jnp.float32:
        kernel = _conv1d_kernel_acc_in_out
        scratch_shapes = ()
        use_scratch = False
    else:
        kernel = _conv1d_kernel_acc_scratch
        scratch_shapes = (pltpu.VMEM((tm, tn), jnp.float32),)
        use_scratch = True

    w_spec_kwargs = {}
    if w_bufs > 2:
        w_spec_kwargs["pipeline_mode"] = pl.Buffered(w_bufs)
    w_spec = pl.BlockSpec((tk, tn), lambda i, j, k: (k, j), **w_spec_kwargs)

    fp = _footprint_bytes(tm, tn, tk, itemsize, odt.itemsize, use_scratch, w_bufs)
    vmem_limit = int(min(cfg["vmem_cap"], max(fp + (8 << 20), 32 << 20)))

    # Real HBM traffic under this tiling: x is re-read nf/tn times, W re-read M/tm times.
    cost = pl.CostEstimate(
        flops=2 * m_pad * nx_pad * nf_pad,
        transcendentals=0,
        bytes_accessed=m_pad * nx_pad * itemsize * grid[1]
        + nx_pad * nf_pad * itemsize * grid[0]
        + nf_pad * 4
        + m_pad * nf_pad * odt.itemsize,
    )

    out2d = pl.pallas_call(
        kernel,
        out_shape=jax.ShapeDtypeStruct((m_pad, nf_pad), odt),
        grid_spec=pltpu.PrefetchScalarGridSpec(
            num_scalar_prefetch=0,
            grid=grid,
            in_specs=[
                pl.BlockSpec((tm, tk), lambda i, j, k: (i, k)),   # x tile
                w_spec,                                           # weight tile
                pl.BlockSpec((1, tn), lambda i, j, k: (0, j)),    # bias tile (f32)
            ],
            out_specs=pl.BlockSpec((tm, tn), lambda i, j, k: (i, j)),
            scratch_shapes=scratch_shapes,
        ),
        compiler_params=pltpu.CompilerParams(
            dimension_semantics=("parallel", "parallel", "arbitrary"),
            vmem_limit_bytes=vmem_limit,
        ),
        cost_estimate=cost,
    )(x2d, w, b2)

    if nf_pad != nf:
        out2d = out2d[:, :nf]
    if m_pad != M:
        out2d = out2d[:M]
    return out2d.reshape(*orig_shape[:-1], nf)


if __name__ == "__main__":
    key = jax.random.PRNGKey(0)

    # --- Test 1: small shapes implied by the module (f32, single-k path) ----------------
    B, T, NX, NF = 2, 8, 32, 64
    kx, kw = jax.random.split(key)
    x = jax.random.normal(kx, (B, T, NX), dtype=jnp.float32)
    weight = 0.02 * jax.random.normal(kw, (NX, NF), dtype=jnp.float32)  # init.normal_(std=0.02)
    bias = jnp.zeros((NF,), dtype=jnp.float32)

    y = jax.block_until_ready(conv1d_forward(x, weight, bias))
    y_ref = (x.reshape(-1, NX) @ weight + bias).reshape(B, T, NF)
    assert y.shape == (B, T, NF)
    assert jnp.allclose(y, y_ref, atol=1e-5, rtol=1e-5)

    # --- Test 2: bf16 compute / f32 out, tk forced small -> accumulate-in-output path ---
    B2, T2, NX2, NF2 = 2, 64, 512, 512
    k1, k2, k3 = jax.random.split(key, 3)
    x2 = jax.random.normal(k1, (B2, T2, NX2), dtype=jnp.float32)
    w2 = 0.02 * jax.random.normal(k2, (NX2, NF2), dtype=jnp.float32)
    b2 = 0.1 * jax.random.normal(k3, (NF2,), dtype=jnp.float32)

    y2 = jax.block_until_ready(
        conv1d_forward(x2, w2, b2, tk=256, compute_dtype=jnp.bfloat16, out_dtype=jnp.float32)
    )
    ref2 = (
        jnp.dot(
            x2.reshape(-1, NX2).astype(jnp.bfloat16),
            w2.astype(jnp.bfloat16),
            preferred_element_type=jnp.float32,
        )
        + b2
    ).reshape(B2, T2, NF2)
    assert y2.shape == (B2, T2, NF2)
    assert jnp.allclose(y2, ref2, atol=2e-2, rtol=2e-2)

    # --- Test 3: decode-style ragged M (row padding only to the sublane multiple) -------
    B3, T3, NX3, NF3 = 3, 1, 256, 512
    x3 = jax.random.normal(k1, (B3, T3, NX3), dtype=jnp.float32)
    w3 = 0.02 * jax.random.normal(k2, (NX3, NF3), dtype=jnp.float32)
    b3 = jnp.zeros((NF3,), dtype=jnp.float32)
    y3 = jax.block_until_ready(conv1d_forward(x3, w3, b3))
    ref3 = (x3.reshape(-1, NX3) @ w3 + b3).reshape(B3, T3, NF3)
    assert jnp.allclose(y3, ref3, atol=1e-4, rtol=1e-4)

    # --- Test 4: bf16 output with multi-step reduction -> scratch-accumulator path ------
    B4, T4, NX4, NF4 = 1, 64, 256, 256
    x4 = jax.random.normal(k1, (B4, T4, NX4), dtype=jnp.float32)
    w4 = 0.02 * jax.random.normal(k2, (NX4, NF4), dtype=jnp.float32)
    b4 = 0.1 * jax.random.normal(k3, (NF4,), dtype=jnp.float32)
    y4 = jax.block_until_ready(
        conv1d_forward(x4, w4, b4, tk=128, compute_dtype=jnp.bfloat16, out_dtype=jnp.bfloat16)
    )
    ref4 = (
        jnp.dot(
            x4.reshape(-1, NX4).astype(jnp.bfloat16),
            w4.astype(jnp.bfloat16),
            preferred_element_type=jnp.float32,
        )
        + b4
    ).reshape(B4, T4, NF4).astype(jnp.bfloat16)
    assert jnp.allclose(y4.astype(jnp.float32), ref4.astype(jnp.float32), atol=3e-2, rtol=3e-2)

    print("KERNEL_OK")
</pallas_src>

<mosaic_0001>
module attributes {stable_mosaic.version = 11 : i64} {
  func.func @_conv1d_kernel_single_k(%arg0: i32, %arg1: i32, %arg2: i32, %arg3: memref<16x32xf32, #tpu.memory_space<vmem>>, %arg4: memref<32x64xf32, #tpu.memory_space<vmem>>, %arg5: memref<1x64xf32, #tpu.memory_space<vmem>>, %arg6: memref<16x64xf32, #tpu.memory_space<vmem>>) attributes {dimension_semantics = [#tpu.dimension_semantics<parallel>, #tpu.dimension_semantics<parallel>, #tpu.dimension_semantics<arbitrary>], iteration_bounds = array<i64: 1, 1, 1>, scalar_prefetch = 0 : i64, scratch_operands = 0 : i64, tpu.core_type = #tpu.core_type<tc>, window_params = [{transform_indices = @transform_0, window_bounds = array<i64: 16, 32>}, {transform_indices = @transform_1, window_bounds = array<i64: 32, 64>}, {transform_indices = @transform_2, window_bounds = array<i64: 1, 64>}, {transform_indices = @transform_3, window_bounds = array<i64: 16, 64>}]} {
    %c0 = arith.constant 0 : index
    %c0_0 = arith.constant 0 : index
    %0 = vector.load %arg3[%c0, %c0_0] : memref<16x32xf32, #tpu.memory_space<vmem>>, vector<16x32xf32>
    %c0_1 = arith.constant 0 : index
    %c0_2 = arith.constant 0 : index
    %1 = vector.load %arg4[%c0_1, %c0_2] : memref<32x64xf32, #tpu.memory_space<vmem>>, vector<32x64xf32>
    %cst = arith.constant dense<0.000000e+00> : vector<16x64xf32>
    %2 = tpu.matmul %0, %1, %cst {dimension_numbers = #tpu.dot_dimension_numbers<[1], [0], [0], [1], [0, 0, 1, 1], [], []>} : vector<16x32xf32>, vector<32x64xf32>, vector<16x64xf32> -> vector<16x64xf32>
    %c0_3 = arith.constant 0 : index
    %c0_4 = arith.constant 0 : index
    %3 = vector.load %arg5[%c0_3, %c0_4] : memref<1x64xf32, #tpu.memory_space<vmem>>, vector<1x64xf32>
    %4 = vector.broadcast %3 : vector<1x64xf32> to vector<16x64xf32>
    %5 = arith.addf %2, %4 : vector<16x64xf32>
    %c0_5 = arith.constant 0 : index
    %c0_6 = arith.constant 0 : index
    %6 = vector.load %arg6[%c0_5, %c0_6] : memref<16x64xf32, #tpu.memory_space<vmem>>, vector<16x64xf32>
    tpu.vector_store %arg6[%c0_5, %c0_6], %5 {strides = array<i32>} : memref<16x64xf32, #tpu.memory_space<vmem>>, vector<16x64xf32>,
    return
  }
  func.func @transform_0(%arg0: i32, %arg1: i32, %arg2: i32) -> (i32, i32) {
    %c0_i32 = arith.constant 0 : i32
    return %arg0, %arg2 : i32, i32
  }
  func.func @transform_1(%arg0: i32, %arg1: i32, %arg2: i32) -> (i32, i32) {
    %c0_i32 = arith.constant 0 : i32
    return %arg2, %arg1 : i32, i32
  }
  func.func @transform_2(%arg0: i32, %arg1: i32, %arg2: i32) -> (i32, i32) {
    %c0_i32 = arith.constant 0 : i32
    %c0_i32_0 = arith.constant 0 : i32
    return %c0_i32, %arg1 : i32, i32
  }
  func.func @transform_3(%arg0: i32, %arg1: i32, %arg2: i32) -> (i32, i32) {
    %c0_i32 = arith.constant 0 : i32
    return %arg0, %arg1 : i32, i32
  }
}

</mosaic_0001>

<bundles_post_ra>
// kernel: conv1d_forward.1
= control target key start
LH: loop header
LB: loop body
LE: loop exit
PB: predicated region body
PF: predicated region fallthrough
CT: control target
= control target key end

     0   :  { %8 = vsyncpa [#allocation3], 0  ;;  %s246_s0 = inlined_call_operand.hbm [shape: f32[16,32], index: 0, kind: input, shape index: {}]   ;;  %s247_s1 = inlined_call_operand.hbm [shape: f32[32,64], index: 1, kind: input, shape index: {}]   ;;  %s248_s2 = inlined_call_operand.vmem [shape: f32[1,64], index: 2, kind: input, shape index: {}]   ;;  %s249_s3 = inlined_call_operand.hbm [shape: f32[16,64], index: 3, kind: output, shape index: {}]  }
   0x1   :  { %9 = vsyncpa [#allocation6], 0 }
   0x2   :  { %10 = vsyncpa [#allocation4], 0  ;;  %s15_s14 = sshll.u32 %s246_s0, 4  ;;  %s200_s15 = smov [#allocation2]   ;;  %s16_s14 = int_to_ptr.hbm [resolvable:$true] %s15_s14 }
   0x3   :  { %s17_s16 = sshll.u32 %s200_s15, 4  ;;  %s28_s19 = sshll.u32 %s247_s1, 4  ;;  %s18_s16 = int_to_ptr.vmem [resolvable:$true] %s17_s16  ;;  %s29_s19 = int_to_ptr.hbm [resolvable:$true] %s28_s19 }
   0x4   :  { %s201_s20 = smov 128   ;;  %s202_s21 = smov 8  }
   0x5   :  { %23 = dma.hbm_to_vmem [thread:$0]  %s16_s14, 256, %s18_s16, [#allocation3], %s201_s20, %s201_s20, %s202_s21  }
   0x6   :  { %s203_s22 = smov [#allocation5]  }
   0x7   :  { %s30_s23 = sshll.u32 %s203_s22, 4  ;;  %s31_s23 = int_to_ptr.vmem [resolvable:$true] %s30_s23 }
   0x8   :  { %36 = dma.hbm_to_vmem [thread:$0]  %s29_s19, 512, %s31_s23, [#allocation6], %s201_s20, %s201_s20, %s202_s21  }
   0x9   :  { %194 = dma.done.wait [#allocation3], 256  }
   0xa   :  { %195 = vsyncadd [#allocation3], 4294967040 }
   0xb   :  { %196 = dma.done.wait [#allocation6], 512  }
   0xc   :  { %197 = vsyncadd [#allocation6], 4294966784  ;;  %v52_v0 = vld [vmem:[#allocation5 + $0x18] sm:$0xff]  ;;  %v51_v1 = vld [vmem:[#allocation5 + $0x10] sm:$0xff]  ;;  %vm57_vm0 = vcmask 261120   ;;  %s204_s24 = smov [#allocation7]  }
   0xd   :  { %76 = vmatpush.msra.mxu0 %v52_v0  ;;  %112 = vmatpush.msra.mxu1 %v52_v0  ;;  %v50_v2 = vld [vmem:[#allocation5 + $0x8] sm:$0xff]  ;;  %v49_v3 = vld [vmem:[#allocation5] sm:$0xff]  ;;  %v47_v4 = vld [vmem:[#allocation2] sm:$0xff]  ;;  %s94_s25 = sshll.u32 %s204_s24, 4  ;;  %s96_s28 = sshll.u32 %s249_s3, 4  ;;  %vm87_vm1 = vcmask 523264   ;;  %s95_s25 = int_to_ptr.vmem [resolvable:$true] %s94_s25  ;;  %s97_s28 = int_to_ptr.hbm [resolvable:$true] %s96_s28 }
   0xe   :  { %v48_v5 = vld [vmem:[#allocation2 + $0x8] sm:$0xff]  ;;  %v121_v6 = vld [vmem:[%s248_s2] ss:$0 sm:$0xff] }
   0xf   :  { %77 = vmatpush.msra.mxu0 %v51_v1  ;;  %113 = vmatpush.msra.mxu1 %v51_v1 }
  0x11   :  { %78 = vmatpush.msra.mxu0 %v50_v2  ;;  %114 = vmatpush.msra.mxu1 %v50_v2 }
  0x13   :  { %79 = vmatpush.msra.mxu0 %v49_v3  ;;  %115 = vmatpush.msra.mxu1 %v49_v3 }
  0x14   :  { %110 = vmatmul.msk.f32.vlgmr.msra.gmra.mxu0 %vm57_vm0, %v47_v4  ;;  %111 = vmatmul.msk.f32.vlgmr.msra.gmra.mxu1 %vm57_vm0, %v48_v5 }
  0x91   :  { %v81_v7 = vpop.f32.mrf.mxu0  ;;  %v84_v8 = vpop.f32.mrf.mxu1 }
  0x92   :  { %v82_v9 = vadd.f32 %v121_v6, %v81_v7  ;;  %v85_v10 = vadd.f32 %v121_v6, %v84_v8 }
  0x94   :  { %88 = vst.msk [vmem:[#allocation7] sm:$0xff] %vm87_vm1, %v82_v9 }
  0x95   :  { %89 = vst.msk [vmem:[#allocation7 + $0x8] sm:$0xff] %vm87_vm1, %v85_v10 }
  0x96   :  { %102 = dma.vmem_to_hbm [thread:$0]  %s95_s25, 256, %s97_s28, [#allocation4], %s201_s20, %s201_s20, %s202_s21  }
  0x97   :  { %198 = dma.done.wait [#allocation4], 256  }
  0x98   :  { %199 = vsyncadd [#allocation4], 4294967040 }
  0x99   :  { %107 = vsyncpa [#allocation3], 1 }
  0x9a   :  { %108 = vsyncpa [#allocation6], 1 }
  0x9b   :  { %109 = vsyncpa [#allocation4], 1 }

</bundles_post_ra>
